<compile_context>
chip_gen: v6e
topology: v6e:2x2x1
jax: 0.10.0
libtpu: 0.0.40
codegen_flags: <defaults>
</compile_context>

<pallas_src>
import functools
import math

import jax
import jax.numpy as jnp
from jax.experimental import pallas as pl
from jax.experimental.pallas import tpu as pltpu


def _round_up(x, m):
    return ((x + m - 1) // m) * m


def _vmem_capacity_bytes(default=64 * 2 ** 20):
    """Physical VMEM of the attached TPU (conservative default if unknown)."""
    try:
        cap = getattr(pltpu.get_tpu_info(), "vmem_capacity_bytes", None)
        if cap:
            return int(cap)
    except Exception:
        pass
    return default


def _conv1d_kernel(x_ref, xh_ref, w_ref, b_ref, o_ref, xs_ref, *acc_scratch,
                   K, C_in, stride, dilation, tile_t, fold):
    """One (batch, c_out-tile, time-tile) grid step.

    x_ref  : (rows_blk, C_in)        contiguous input rows of this time tile
    xh_ref : (h_blk, C_in)           halo rows immediately after the tile
    w_ref  : (K*C_in, tile_co)       weights, rows ordered (k, c_in)
    b_ref  : (1, tile_co)            float32 bias
    o_ref  : (tile_t, tile_co)       output tile (exact shape; partial tiles
                                     are masked by Pallas on store)
    xs_ref : (rows_blk+h_blk, C_in)  VMEM staging buffer (tile + halo)
    acc_scratch : ((tile_t, tile_co) f32,) only for the non-folded path
    """
    rows_blk = x_ref.shape[0]
    # Stage tile + halo contiguously so every tap is a static-offset slice.
    xs_ref[:rows_blk, :] = x_ref[...]
    xs_ref[rows_blk:, :] = xh_ref[...]

    def tap(k):
        start = k * dilation                       # static Python int
        if stride == 1:
            return xs_ref[pl.ds(start, tile_t), :]
        return xs_ref[pl.ds(start, tile_t, stride), :]

    if fold:
        # Fold the K taps into the contraction axis: one MXU matmul.
        patches = jnp.concatenate([tap(k) for k in range(K)], axis=-1)
        acc = jnp.dot(patches, w_ref[...], preferred_element_type=jnp.float32)
        o_ref[...] = (acc + b_ref[...]).astype(o_ref.dtype)
    else:
        acc_ref = acc_scratch[0]
        acc_ref[...] = jnp.zeros_like(acc_ref)
        for k in range(K):                         # K is small & static
            acc_ref[...] += jnp.dot(tap(k), w_ref[pl.ds(k * C_in, C_in), :],
                                    preferred_element_type=jnp.float32)
        o_ref[...] = (acc_ref[...] + b_ref[...]).astype(o_ref.dtype)


def conv1d_pallas(x, weight, bias=None, *, stride=1, padding=0, dilation=1,
                  tile_t=256, tile_co=None):
    """Equivalent of Conv.forward: x (B, T, C_in) -> (B, T_out, C_out).

    weight: (C_out, C_in, K)  (PyTorch Conv1d layout); bias: (C_out,) or None.
    """
    B, T, C_in = x.shape
    C_out, C_in_w, K = weight.shape
    assert C_in == C_in_w, (C_in, C_in_w)
    assert stride >= 1 and dilation >= 1 and padding >= 0
    dtype = x.dtype
    isz = jnp.dtype(dtype).itemsize

    T_out = (T + 2 * padding - dilation * (K - 1) - 1) // stride + 1
    assert T_out > 0

    KC = K * C_in
    fold = KC <= 256                      # single-matmul path for small K*C_in

    # ---- Tile geometry ------------------------------------------------------
    sub = max(8, 32 // isz)               # sublane packing: 8 f32 / 16 bf16 / 32 i8
    halo = (K - 1) * dilation              # rows a tile reads past its own block
    h_blk = max(sub, _round_up(max(halo, 1), sub))
    granule = math.lcm(sub, h_blk)         # tile_t must be a multiple of h_blk

    if tile_co is None:
        tile_co = C_out if C_out <= 256 else 256
    tile_t = max(granule, min(_round_up(tile_t, granule),
                              _round_up(T_out, granule)))

    vmem_cap = _vmem_capacity_bytes()

    def est_vmem(tt, tc):
        rows = tt * stride
        est = 2 * rows * C_in * isz        # x tile (double buffered)
        est += 2 * h_blk * C_in * isz      # halo block
        est += 2 * KC * tc * isz           # weights (assume double buffered)
        est += 2 * tc * 4                  # bias
        est += 2 * tt * tc * isz           # output tile
        est += (rows + h_blk) * C_in * isz  # staging scratch
        if not fold:
            est += tt * tc * 4             # f32 accumulator scratch
        return est

    soft_budget = max(16 * 2 ** 20, vmem_cap - 16 * 2 ** 20)
    while tile_t > granule and est_vmem(tile_t, tile_co) > soft_budget:
        tile_t = max(granule, _round_up(tile_t // 2, granule))
    if est_vmem(tile_t, tile_co) > soft_budget and tile_co > 128:
        tile_co = 128

    rows_blk = tile_t * stride
    nt = pl.cdiv(T_out, tile_t)
    nco = pl.cdiv(C_out, tile_co)
    halo_ratio = rows_blk // h_blk         # h_blk divides rows_blk by construction

    # ---- Host-side operand prep --------------------------------------------
    # Time-only zero pad: `padding` rows in front plus a tail so every tile and
    # its halo block are fully in bounds.  No channel padding, no im2col slab.
    L = nt * rows_blk + h_blk
    pad_lo, pad_hi = padding, L - T - padding
    assert pad_hi >= 0
    if pad_lo or pad_hi:
        x_pad = jnp.pad(x, ((0, 0), (pad_lo, pad_hi), (0, 0)))
    else:
        x_pad = x
    # TODO(synk): the host-side time pad is still one extra HBM pass over x; it
    # could be removed by masking the boundary tiles inside the kernel.

    # weight (C_out, C_in, K) -> (K*C_in, C_out); row index = k*C_in + c_in.
    w2 = jnp.transpose(weight, (2, 1, 0)).reshape(KC, C_out).astype(dtype)
    if bias is None:
        b2 = jnp.zeros((1, C_out), jnp.float32)
    else:
        b2 = bias.astype(jnp.float32).reshape(1, C_out)

    # ---- pallas_call ---------------------------------------------------------
    est = est_vmem(tile_t, tile_co)
    hard_cap = max(16 * 2 ** 20, vmem_cap - 8 * 2 ** 20)  # never above physical VMEM
    vmem_limit = int(min(hard_cap, max(48 * 2 ** 20, 2 * est)))

    # Megacore: keep whole batches per core when possible so each x block is
    # DMA'd by exactly one core; with B == 1 split the output-channel axis.
    if B > 1:
        dims = ("parallel", "arbitrary", "arbitrary")
    else:
        dims = ("arbitrary", "parallel", "arbitrary")

    kernel = functools.partial(_conv1d_kernel, K=K, C_in=C_in, stride=stride,
                               dilation=dilation, tile_t=tile_t, fold=fold)

    scratch_shapes = [pltpu.VMEM((rows_blk + h_blk, C_in), dtype)]
    if not fold:
        scratch_shapes.append(pltpu.VMEM((tile_t, tile_co), jnp.float32))

    def build(single_buffer_consts):
        const_kwargs = {}
        if single_buffer_consts:
            # Weights/bias have a constant block index over the inner time axis;
            # single-buffering halves their VMEM footprint.
            const_kwargs = dict(pipeline_mode=pl.Buffered(1))
        in_specs = [
            # Contiguous input rows of this time tile.
            pl.BlockSpec((None, rows_blk, C_in), lambda b, co, i: (b, i, 0)),
            # Halo: the h_blk rows immediately after the tile (same array,
            # second BlockSpec) -> tile-sized VMEM, ~1x HBM traffic for x.
            pl.BlockSpec((None, h_blk, C_in),
                         lambda b, co, i: (b, (i + 1) * halo_ratio, 0)),
            pl.BlockSpec((KC, tile_co), lambda b, co, i: (0, co), **const_kwargs),
            pl.BlockSpec((1, tile_co), lambda b, co, i: (0, co), **const_kwargs),
        ]
        return pl.pallas_call(
            kernel,
            out_shape=jax.ShapeDtypeStruct((B, T_out, C_out), dtype),
            grid=(B, nco, nt),
            in_specs=in_specs,
            out_specs=pl.BlockSpec((None, tile_t, tile_co),
                                   lambda b, co, i: (b, i, co)),
            scratch_shapes=scratch_shapes,
            compiler_params=pltpu.CompilerParams(
                dimension_semantics=dims,
                vmem_limit_bytes=vmem_limit,
            ),
        )

    try:
        return build(True)(x_pad, x_pad, w2, b2)
    except Exception:
        # Fallback for JAX versions without BlockSpec.pipeline_mode support.
        return build(False)(x_pad, x_pad, w2, b2)


def _conv1d_reference(x, weight, bias, stride, padding, dilation):
    """Pure-JAX im2col reference at highest precision."""
    B, T, C_in = x.shape
    C_out, _, K = weight.shape
    T_out = (T + 2 * padding - dilation * (K - 1) - 1) // stride + 1
    xp = jnp.pad(x, ((0, 0), (padding, padding), (0, 0)))
    pos = (jnp.arange(T_out) * stride)[:, None] + (jnp.arange(K) * dilation)[None, :]
    patches = xp[:, pos, :]                                  # (B, T_out, K, C_in)
    y = jnp.einsum("btkc,ock->bto", patches, weight,
                   precision=jax.lax.Precision.HIGHEST)
    if bias is not None:
        y = y + bias[None, None, :]
    return y


if __name__ == "__main__":
    key = jax.random.PRNGKey(0)
    k1, k2, k3, k4, k5 = jax.random.split(key, 5)

    # Case 1: Conv(8, 16, kernel_size=3, padding=1) -- small-channel, folded-K
    # (single MXU matmul) path.
    B, T, C_in, C_out, K = 2, 16, 8, 16, 3
    x = jax.random.normal(k1, (B, T, C_in), dtype=jnp.float32)
    w = jax.random.normal(k2, (C_out, C_in, K), dtype=jnp.float32) * 0.1
    b = jax.random.normal(k3, (C_out,), dtype=jnp.float32) * 0.1
    y = jax.block_until_ready(
        conv1d_pallas(x, w, b, stride=1, padding=1, dilation=1))
    y_ref = _conv1d_reference(x, w, b, 1, 1, 1)
    assert y.shape == y_ref.shape, (y.shape, y_ref.shape)
    assert jnp.allclose(y, y_ref, atol=2e-3, rtol=2e-3), \
        float(jnp.max(jnp.abs(y - y_ref)))

    # Case 2: larger K*C_in exercises the K-loop / VMEM-accumulator path,
    # dilation=2, no bias, and a partial (masked) output time tile.
    B, T, C_in, C_out, K = 1, 20, 160, 32, 2
    x = jax.random.normal(k4, (B, T, C_in), dtype=jnp.float32)
    w = jax.random.normal(k5, (C_out, C_in, K), dtype=jnp.float32) * 0.05
    y = jax.block_until_ready(
        conv1d_pallas(x, w, None, stride=1, padding=0, dilation=2))
    y_ref = _conv1d_reference(x, w, None, 1, 0, 2)
    assert y.shape == y_ref.shape, (y.shape, y_ref.shape)
    assert jnp.allclose(y, y_ref, atol=1e-2, rtol=1e-2), \
        float(jnp.max(jnp.abs(y - y_ref)))

    print("KERNEL_OK")
</pallas_src>

<mosaic_0001>
module attributes {stable_mosaic.version = 11 : i64} {
  func.func @_conv1d_kernel(%arg0: i32, %arg1: i32, %arg2: i32, %arg3: memref<1x16x8xf32, #tpu.memory_space<vmem>>, %arg4: memref<1x8x8xf32, #tpu.memory_space<vmem>>, %arg5: memref<24x16xf32, #tpu.memory_space<vmem>>, %arg6: memref<1x16xf32, #tpu.memory_space<vmem>>, %arg7: memref<1x16x16xf32, #tpu.memory_space<vmem>>, %arg8: memref<24x8xf32, #tpu.memory_space<vmem>>) attributes {dimension_semantics = [#tpu.dimension_semantics<parallel>, #tpu.dimension_semantics<arbitrary>, #tpu.dimension_semantics<arbitrary>], iteration_bounds = array<i64: 2, 1, 1>, scalar_prefetch = 0 : i64, scratch_operands = 1 : i64, tpu.core_type = #tpu.core_type<tc>, window_params = [{transform_indices = @transform_0, window_bounds = array<i64: 1, 16, 8>}, {transform_indices = @transform_1, window_bounds = array<i64: 1, 8, 8>}, {pipeline_mode = #tpu.pipeline_mode<synchronous>, transform_indices = @transform_2, window_bounds = array<i64: 24, 16>}, {pipeline_mode = #tpu.pipeline_mode<synchronous>, transform_indices = @transform_3, window_bounds = array<i64: 1, 16>}, {transform_indices = @transform_4, window_bounds = array<i64: 1, 16, 16>}]} {
    %c0 = arith.constant 0 : index
    %c0_0 = arith.constant 0 : index
    %c0_1 = arith.constant 0 : index
    %0 = vector.load %arg3[%c0, %c0_0, %c0_1] : memref<1x16x8xf32, #tpu.memory_space<vmem>>, vector<1x16x8xf32>
    %1 = vector.shape_cast %0 : vector<1x16x8xf32> to vector<16x8xf32>
    %c0_2 = arith.constant 0 : index
    %c0_3 = arith.constant 0 : index
    %2 = vector.load %arg8[%c0_2, %c0_3] : memref<24x8xf32, #tpu.memory_space<vmem>>, vector<16x8xf32>
    tpu.vector_store %arg8[%c0_2, %c0_3], %1 {strides = array<i32>} : memref<24x8xf32, #tpu.memory_space<vmem>>, vector<16x8xf32>,
    %c0_4 = arith.constant 0 : index
    %c0_5 = arith.constant 0 : index
    %c0_6 = arith.constant 0 : index
    %3 = vector.load %arg4[%c0_4, %c0_5, %c0_6] : memref<1x8x8xf32, #tpu.memory_space<vmem>>, vector<1x8x8xf32>
    %4 = vector.shape_cast %3 : vector<1x8x8xf32> to vector<8x8xf32>
    %c16 = arith.constant 16 : index
    %c0_7 = arith.constant 0 : index
    %5 = vector.load %arg8[%c16, %c0_7] : memref<24x8xf32, #tpu.memory_space<vmem>>, vector<8x8xf32>
    tpu.vector_store %arg8[%c16, %c0_7], %4 {strides = array<i32>} : memref<24x8xf32, #tpu.memory_space<vmem>>, vector<8x8xf32>,
    %c0_8 = arith.constant 0 : index
    %c0_9 = arith.constant 0 : index
    %6 = vector.load %arg8[%c0_8, %c0_9] : memref<24x8xf32, #tpu.memory_space<vmem>>, vector<16x8xf32>
    %c1 = arith.constant 1 : index
    %c0_10 = arith.constant 0 : index
    %7 = vector.load %arg8[%c1, %c0_10] : memref<24x8xf32, #tpu.memory_space<vmem>>, vector<16x8xf32>
    %c2 = arith.constant 2 : index
    %c0_11 = arith.constant 0 : index
    %8 = vector.load %arg8[%c2, %c0_11] : memref<24x8xf32, #tpu.memory_space<vmem>>, vector<16x8xf32>
    %9 = tpu.concatenate %6, %7, %8 in 1 : vector<16x8xf32>, vector<16x8xf32>, vector<16x8xf32> -> vector<16x24xf32>
    %c0_12 = arith.constant 0 : index
    %c0_13 = arith.constant 0 : index
    %10 = vector.load %arg5[%c0_12, %c0_13] : memref<24x16xf32, #tpu.memory_space<vmem>>, vector<24x16xf32>
    %cst = arith.constant dense<0.000000e+00> : vector<16x16xf32>
    %11 = tpu.matmul %9, %10, %cst {dimension_numbers = #tpu.dot_dimension_numbers<[1], [0], [0], [1], [0, 0, 1, 1], [], []>} : vector<16x24xf32>, vector<24x16xf32>, vector<16x16xf32> -> vector<16x16xf32>
    %c0_14 = arith.constant 0 : index
    %c0_15 = arith.constant 0 : index
    %12 = vector.load %arg6[%c0_14, %c0_15] : memref<1x16xf32, #tpu.memory_space<vmem>>, vector<1x16xf32>
    %13 = vector.broadcast %12 : vector<1x16xf32> to vector<16x16xf32>
    %14 = arith.addf %11, %13 : vector<16x16xf32>
    %c0_16 = arith.constant 0 : index
    %c0_17 = arith.constant 0 : index
    %c0_18 = arith.constant 0 : index
    %15 = vector.load %arg7[%c0_16, %c0_17, %c0_18] : memref<1x16x16xf32, #tpu.memory_space<vmem>>, vector<1x16x16xf32>
    %16 = vector.shape_cast %15 : vector<1x16x16xf32> to vector<16x16xf32>
    %17 = vector.shape_cast %14 : vector<16x16xf32> to vector<1x16x16xf32>
    tpu.vector_store %arg7[%c0_16, %c0_17, %c0_18], %17 {strides = array<i32>} : memref<1x16x16xf32, #tpu.memory_space<vmem>>, vector<1x16x16xf32>,
    return
  }
  func.func @transform_0(%arg0: i32, %arg1: i32, %arg2: i32) -> (i32, i32, i32) {
    %c0_i32 = arith.constant 0 : i32
    %c0_i32_0 = arith.constant 0 : i32
    return %arg0, %arg2, %c0_i32 : i32, i32, i32
  }
  func.func @transform_1(%arg0: i32, %arg1: i32, %arg2: i32) -> (i32, i32, i32) {
    %c1_i32 = arith.constant 1 : i32
    %0 = arith.addi %arg2, %c1_i32 : i32
    %c2_i32 = arith.constant 2 : i32
    %1 = arith.muli %0, %c2_i32 : i32
    %c0_i32 = arith.constant 0 : i32
    %c0_i32_0 = arith.constant 0 : i32
    return %arg0, %1, %c0_i32 : i32, i32, i32
  }
  func.func @transform_2(%arg0: i32, %arg1: i32, %arg2: i32) -> (i32, i32) {
    %c0_i32 = arith.constant 0 : i32
    %c0_i32_0 = arith.constant 0 : i32
    return %c0_i32, %arg1 : i32, i32
  }
  func.func @transform_3(%arg0: i32, %arg1: i32, %arg2: i32) -> (i32, i32) {
    %c0_i32 = arith.constant 0 : i32
    %c0_i32_0 = arith.constant 0 : i32
    return %c0_i32, %arg1 : i32, i32
  }
  func.func @transform_4(%arg0: i32, %arg1: i32, %arg2: i32) -> (i32, i32, i32) {
    %c0_i32 = arith.constant 0 : i32
    return %arg0, %arg2, %arg1 : i32, i32, i32
  }
}

module attributes {stable_mosaic.version = 11 : i64} {
  func.func @_conv1d_kernel(%arg0: i32, %arg1: i32, %arg2: i32, %arg3: memref<1x16x8xf32, #tpu.memory_space<vmem>>, %arg4: memref<1x8x8xf32, #tpu.memory_space<vmem>>, %arg5: memref<24x16xf32, #tpu.memory_space<vmem>>, %arg6: memref<1x16xf32, #tpu.memory_space<vmem>>, %arg7: memref<1x16x16xf32, #tpu.memory_space<vmem>>, %arg8: memref<24x8xf32, #tpu.memory_space<vmem>>) attributes {dimension_semantics = [#tpu.dimension_semantics<parallel>, #tpu.dimension_semantics<arbitrary>, #tpu.dimension_semantics<arbitrary>], iteration_bounds = array<i64: 2, 1, 1>, scalar_prefetch = 0 : i64, scratch_operands = 1 : i64, tpu.core_type = #tpu.core_type<tc>, window_params = [{transform_indices = @transform_0, window_bounds = array<i64: 1, 16, 8>}, {transform_indices = @transform_1, window_bounds = array<i64: 1, 8, 8>}, {transform_indices = @transform_2, window_bounds = array<i64: 24, 16>}, {transform_indices = @transform_3, window_bounds = array<i64: 1, 16>}, {transform_indices = @transform_4, window_bounds = array<i64: 1, 16, 16>}]} {
    %c0 = arith.constant 0 : index
    %c0_0 = arith.constant 0 : index
    %c0_1 = arith.constant 0 : index
    %0 = vector.load %arg3[%c0, %c0_0, %c0_1] : memref<1x16x8xf32, #tpu.memory_space<vmem>>, vector<1x16x8xf32>
    %1 = vector.shape_cast %0 : vector<1x16x8xf32> to vector<16x8xf32>
    %c0_2 = arith.constant 0 : index
    %c0_3 = arith.constant 0 : index
    %2 = vector.load %arg8[%c0_2, %c0_3] : memref<24x8xf32, #tpu.memory_space<vmem>>, vector<16x8xf32>
    tpu.vector_store %arg8[%c0_2, %c0_3], %1 {strides = array<i32>} : memref<24x8xf32, #tpu.memory_space<vmem>>, vector<16x8xf32>,
    %c0_4 = arith.constant 0 : index
    %c0_5 = arith.constant 0 : index
    %c0_6 = arith.constant 0 : index
    %3 = vector.load %arg4[%c0_4, %c0_5, %c0_6] : memref<1x8x8xf32, #tpu.memory_space<vmem>>, vector<1x8x8xf32>
    %4 = vector.shape_cast %3 : vector<1x8x8xf32> to vector<8x8xf32>
    %c16 = arith.constant 16 : index
    %c0_7 = arith.constant 0 : index
    %5 = vector.load %arg8[%c16, %c0_7] : memref<24x8xf32, #tpu.memory_space<vmem>>, vector<8x8xf32>
    tpu.vector_store %arg8[%c16, %c0_7], %4 {strides = array<i32>} : memref<24x8xf32, #tpu.memory_space<vmem>>, vector<8x8xf32>,
    %c0_8 = arith.constant 0 : index
    %c0_9 = arith.constant 0 : index
    %6 = vector.load %arg8[%c0_8, %c0_9] : memref<24x8xf32, #tpu.memory_space<vmem>>, vector<16x8xf32>
    %c1 = arith.constant 1 : index
    %c0_10 = arith.constant 0 : index
    %7 = vector.load %arg8[%c1, %c0_10] : memref<24x8xf32, #tpu.memory_space<vmem>>, vector<16x8xf32>
    %c2 = arith.constant 2 : index
    %c0_11 = arith.constant 0 : index
    %8 = vector.load %arg8[%c2, %c0_11] : memref<24x8xf32, #tpu.memory_space<vmem>>, vector<16x8xf32>
    %9 = tpu.concatenate %6, %7, %8 in 1 : vector<16x8xf32>, vector<16x8xf32>, vector<16x8xf32> -> vector<16x24xf32>
    %c0_12 = arith.constant 0 : index
    %c0_13 = arith.constant 0 : index
    %10 = vector.load %arg5[%c0_12, %c0_13] : memref<24x16xf32, #tpu.memory_space<vmem>>, vector<24x16xf32>
    %cst = arith.constant dense<0.000000e+00> : vector<16x16xf32>
    %11 = tpu.matmul %9, %10, %cst {dimension_numbers = #tpu.dot_dimension_numbers<[1], [0], [0], [1], [0, 0, 1, 1], [], []>} : vector<16x24xf32>, vector<24x16xf32>, vector<16x16xf32> -> vector<16x16xf32>
    %c0_14 = arith.constant 0 : index
    %c0_15 = arith.constant 0 : index
    %12 = vector.load %arg6[%c0_14, %c0_15] : memref<1x16xf32, #tpu.memory_space<vmem>>, vector<1x16xf32>
    %13 = vector.broadcast %12 : vector<1x16xf32> to vector<16x16xf32>
    %14 = arith.addf %11, %13 : vector<16x16xf32>
    %c0_16 = arith.constant 0 : index
    %c0_17 = arith.constant 0 : index
    %c0_18 = arith.constant 0 : index
    %15 = vector.load %arg7[%c0_16, %c0_17, %c0_18] : memref<1x16x16xf32, #tpu.memory_space<vmem>>, vector<1x16x16xf32>
    %16 = vector.shape_cast %15 : vector<1x16x16xf32> to vector<16x16xf32>
    %17 = vector.shape_cast %14 : vector<16x16xf32> to vector<1x16x16xf32>
    tpu.vector_store %arg7[%c0_16, %c0_17, %c0_18], %17 {strides = array<i32>} : memref<1x16x16xf32, #tpu.memory_space<vmem>>, vector<1x16x16xf32>,
    return
  }
  func.func @transform_0(%arg0: i32, %arg1: i32, %arg2: i32) -> (i32, i32, i32) {
    %c0_i32 = arith.constant 0 : i32
    %c0_i32_0 = arith.constant 0 : i32
    return %arg0, %arg2, %c0_i32 : i32, i32, i32
  }
  func.func @transform_1(%arg0: i32, %arg1: i32, %arg2: i32) -> (i32, i32, i32) {
    %c1_i32 = arith.constant 1 : i32
    %0 = arith.addi %arg2, %c1_i32 : i32
    %c2_i32 = arith.constant 2 : i32
    %1 = arith.muli %0, %c2_i32 : i32
    %c0_i32 = arith.constant 0 : i32
    %c0_i32_0 = arith.constant 0 : i32
    return %arg0, %1, %c0_i32 : i32, i32, i32
  }
  func.func @transform_2(%arg0: i32, %arg1: i32, %arg2: i32) -> (i32, i32) {
    %c0_i32 = arith.constant 0 : i32
    %c0_i32_0 = arith.constant 0 : i32
    return %c0_i32, %arg1 : i32, i32
  }
  func.func @transform_3(%arg0: i32, %arg1: i32, %arg2: i32) -> (i32, i32) {
    %c0_i32 = arith.constant 0 : i32
    %c0_i32_0 = arith.constant 0 : i32
    return %c0_i32, %arg1 : i32, i32
  }
  func.func @transform_4(%arg0: i32, %arg1: i32, %arg2: i32) -> (i32, i32, i32) {
    %c0_i32 = arith.constant 0 : i32
    return %arg0, %arg2, %arg1 : i32, i32, i32
  }
}

</mosaic_0001>

<bundles_post_ra>
// kernel: tpu_custom_call.1
= control target key start
LH: loop header
LB: loop body
LE: loop exit
PB: predicated region body
PF: predicated region fallthrough
CT: control target
= control target key end

     0   :  { %9 = vsyncpa [#allocation4], 0  ;;  %s949_s0 = inlined_call_operand.vmem [shape: f32[2,24,8], index: 0, kind: input, shape index: {}]   ;;  %s950_s1 = inlined_call_operand.vmem [shape: f32[2,24,8], index: 1, kind: input, shape index: {}]   ;;  %s951_s2 = inlined_call_operand.vmem [shape: f32[24,16], index: 2, kind: input, shape index: {}]   ;;  %s952_s3 = inlined_call_operand.vmem [shape: f32[1,16], index: 3, kind: input, shape index: {}]   ;;  %s953_s4 = inlined_call_operand.hbm [shape: f32[2,16,16], index: 4, kind: output, shape index: {}]  }
   0x1   :  { %11 = vsyncpa [#allocation4 + $0x1], 0  ;;  %s808_s15 = smov 0   ;;  %s810_s16 = smov 0  }
   0x2   :  { %s812_s17 = smov 0   ;;  %s814_s18 = smov 0  }
   0x3   :  { %s816_s19 = smov 0   ;;  %s818_s20 = smov 0  }
   0x4 LB: > { %s605_s21 = sadd.s32 4294967295, %s777_s20   ;;  %s606_s22 = sadd.s32 4294967294, %s777_s20   ;;  %s777_s20 = sphi %s818_s20, %s17_s20   ;;  %s773_s19 = sphi %s816_s19, %s960_s19   ;;  %s769_s18 = sphi %s814_s18, %s959_s18   ;;  %s765_s17 = sphi %s812_s17, %s958_s17   ;;  %s761_s16 = sphi %s810_s16, %s957_s16   ;;  %s757_s15 = sphi %s808_s15, %s956_s15  }
   0x5   : > { %s36_s23 = sadd.s32 1, %s773_s19  ;;  %s159_s24 = sadd.s32 1, %s765_s17 }
   0x6   : > { %p38_p0 = scmp.ge.s32.totalorder %s36_s23, 2  ;;  %p169_p1 = scmp.ne.s32.totalorder %s765_s17, %s761_s16 }
   0x7   : > { %p170_p2 = scmp.eq.s32.totalorder %s605_s21, 1  ;;  %p175_p3 = scmp.ne.s32.totalorder %s761_s16, %s757_s15 }
   0x8   : > { %s962_s23 = smov (%p38_p0, %s36_s23), 0  ;;  %p176_p5 = scmp.eq.s32.totalorder %s606_s22, 1 }
   0x9   : > { %p848_p4 = por %p170_p2, %p169_p1  ;;  %s152_s26 = ssub.s32 %s773_s19, %s962_s23 }
   0xa   : > { %p611_p6 = scmp.ge.s32.totalorder %s777_s20, 1  ;;  %p157_p7 = scmp.eq.s32.totalorder %s152_s26, 0 }
   0xb   : > { %p855_p8 = por %p176_p5, %p175_p3  ;;  %p243_p9 = scmp.lt.s32.totalorder %s777_s20, 3 }
   0xc   : > { %s861_s28 = scalar_select %p157_p7, %s765_s17, %s159_s24  }
   0xd   : > { %p244_p10 = pnand %p611_p6, %p243_p9 }
   0xe   : > { %p299_p11 = scmp.lt.s32.totalorder (!%p244_p10), %s769_s18, 1  ;;  %s779_s26 = smov (!%p244_p10), 8  }
   0xf   : > { %247 = sbr.rel (%p244_p10) target bundleno = 366 (0x16e), region = 36  ;;  %s291_s30 = sand.u32 (!%p244_p10), 1, %s761_s16  }
  0x10   : > { %s612_s5 = sshll.u32 (!%p244_p10), %s291_s30, 4  ;;  %s625_s10 = sshll.u32 (!%p244_p10), %s769_s18, 8 }
  0x11   : > { %s900_s13 = scalar_lea.hbm (!%p244_p10), %s953_s4, %s625_s10  ;;  %s903_s14 = scalar_lea.sflag (!%p244_p10), [#allocation4], %s291_s30 }
  0x12   : > { %s781_s21 = smov (!%p244_p10), [#allocation3]  }
  0x13   : > { %s705_s22 = sshll.u32 (!%p244_p10), %s781_s21, 4  ;;  %s706_s22 = int_to_ptr.vmem [resolvable:$false] %s705_s22 }
  0x14   : > { %s300_s29 = scalar_select %p299_p11, %s769_s18, 1  ;;  %v368_v0 = vld [vmem:[%s951_s2 + $0x10] sm:$0xff]  ;;  %v367_v1 = vld [vmem:[%s951_s2 + $0x8] sm:$0xff]  ;;  %vm334_vm0 = vcmask 64512   ;;  %v366_v2 = vld [vmem:[%s951_s2] sm:$0xff]  ;;  %vm363_vm1 = vcmask 130048  }
  0x15   : > { %631 = vmatprep.subr.mxu0 %v368_v0  ;;  %vm376_vm2 = vcmask 195584   ;;  %v615_v20 = vld [vmem:[%s952_s3] ss:$0 sm:$0xff] }
  0x16   : > { %s640_s8 = smul.u32 24, %s300_s29  ;;  %632 = vmatpush3.msra.mxu0 %v368_v0  ;;  %s780_s29 = smov 16  }
  0x17   : > { %633 = vmatprep.subr.mxu0 %v367_v1 }
  0x18   : > { %s306_s11 = scalar_lea.vmem %s949_s0, %s640_s8  ;;  %s624_s12 = sadd.s32 16, %s640_s8  ;;  %634 = vmatpush3.msra.mxu0 %v367_v1 }
  0x19   : > { %v332_v3 = vld [vmem:[%s306_s11] sm:$0xff]  ;;  %v333_v4 = vld [vmem:[%s306_s11 + $0x8] sm:$0xff]  ;;  %s321_s24 = scalar_lea.vmem %s950_s1, %s624_s12  ;;  %635 = vmatprep.subr.mxu0 %v366_v2  ;;  %s293_s8 = scalar_lea.vmem [#allocation3], %s612_s5 }
  0x1a   : > { %335 = vst.msk [vmem:[#allocation2] sm:$0xff] %vm334_vm0, %v332_v3  ;;  %336 = vst.msk [vmem:[#allocation2 + $0x8] sm:$0xff] %vm334_vm0, %v333_v4  ;;  %v337_v5 = vld [vmem:[%s321_s24] sm:$0xff]  ;;  %636 = vmatpush3.msra.mxu0 %v366_v2  ;;  %s477_s9 = sshll.u32 %s293_s8, 4  ;;  %s707_s24 = scalar_lea.vmem %s706_s22, 512  ;;  %s894_s9 = int_to_ptr.vmem [resolvable:$true] %s477_s9 }
  0x1b   : > { %338 = vst.msk [vmem:[#allocation2 + $0x10] sm:$0xff] %vm334_vm0, %v337_v5  ;;  %s701_s18 = scalar_lea.vmem %s894_s9, 256  ;;  %p708_p1 = scmp.lt.s32.totalorder %s894_s9, %s706_s22 }
  0x1c   : > { %p702_p12 = scmp.ne.s32.totalorder %s894_s9, %s701_s18  ;;  %p709_p2 = scmp.lt.s32.totalorder %s707_s24, %s701_s18 }
  0x1e   : > { %p703_p13 = pnand %p702_p12, %p848_p4  ;;  %p710_p3 = por %p709_p2, %p708_p1 }
  0x20   : > { %p704_p0 = pneg %p703_p13 }
  0x21   : > { %v341_v6 = vld [vmem:[#allocation2 + $0x1] sm:$0xff] }
  0x22   : > { %v343_v7 = vld [vmem:[#allocation2 + $0x2] sm:$0xff]  ;;  %347 = vrot.lane.b32.xlu0 %v341_v6, %s779_s26  ;;  %v344_v9 = vld [vmem:[#allocation2 + $0xa] sm:$0xff]  ;;  %p711_p5 = pnand %p710_p3, %p704_p0 }
  0x23   : > { %355 = vrot.lane.b32.xlu1 %v343_v7, %s780_s29  ;;  %v342_v8 = vld [vmem:[#allocation2 + $0x9] sm:$0xff]  ;;  %v339_v10 = vld [vmem:[#allocation2] sm:$0xff] }
  0x24   : > { %v340_v15 = vld [vmem:[#allocation2 + $0x8] sm:$0xff] }
  0x26   : > { %349 = vrot.lane.b32.xlu0 %v342_v8, %s779_s26 }
  0x27   : > { %357 = vrot.lane.b32.xlu1 %v344_v9, %s780_s29 }
  0x94   : > { %v348_v11 = vpop.permute.xlu0 %347 }
  0x95   : > { %v356_v12 = vpop.permute.xlu1 %355  ;;  %v361_v13 = vsel %vm334_vm0, %v339_v10, %v348_v11 }
  0x96   : > { %v364_v14 = vsel %vm363_vm1, %v361_v13, %v356_v12 }
  0x97   : > { %637 = vmatprep.mubr.msk.f32.mxu0 %vm376_vm2, %v364_v14 }
  0x98   : > { %v350_v16 = vpop.permute.xlu0 %349 }
  0x99   : > { %v358_v17 = vpop.permute.xlu1 %357  ;;  %v362_v18 = vsel %vm334_vm0, %v340_v15, %v350_v16 }
  0x9a   : > { %v365_v19 = vsel %vm363_vm1, %v362_v18, %v358_v17 }
  0x9b   : > { %638 = vmatmul.mubr.msk.f32.vlgmr.msra.gmra.mxu0 %vm376_vm2, %v365_v19 }
 0x15b   : > { %v639_v21 = vpop.f32.mrf.mxu0 }
 0x15c   : > { %v455_v22 = vadd.f32 %v639_v21, %v615_v20 }
 0x15d   : > { %v449_v23 = vpop.f32.mrf.mxu0 }
 0x15e   : > { %459 = vst.msk [vmem:[%s293_s8 + $0x8] sm:$0xff] %vm363_vm1, %v455_v22  ;;  %v450_v24 = vadd.f32 %v615_v20, %v449_v23 }
 0x160   : > { %458 = vst.msk [vmem:[%s293_s8] sm:$0xff] %vm363_vm1, %v450_v24 }
 0x161   : > { %714 = shalt.err (!%p711_p5)
}
 0x162   : > { %s715_s29 = scalar_lea.hbm %s900_s13, 256  ;;  %s719_s6 = scalar_lea.hbm %s953_s4, 512 }
 0x163   : > { %p716_p6 = scmp.ne.s32.totalorder %s900_s13, %s715_s29  ;;  %p720_p10 = scmp.lt.s32.totalorder %s900_s13, %s953_s4 }
 0x164   : > { %p721_p11 = scmp.lt.s32.totalorder %s719_s6, %s715_s29 }
 0x165   : > { %p717_p7 = pnand %p716_p6, %p848_p4 }
 0x166   : > { %p722_p12 = por %p721_p11, %p720_p10 }
 0x167   : > { %p718_p9 = pneg %p717_p7 }
 0x169   : > { %p723_p13 = pnand %p722_p12, %p718_p9 }
 0x16b   : > { %726 = shalt.err (!%p723_p13)
}
 0x16c   : > { %s782_s10 = smov 128  }
 0x16d   : > { %642 = dma.vmem_to_hbm [thread:$0]  (%p848_p4), %s894_s9, 256, %s900_s13, %s903_s14, %s782_s10, %s782_s10, %s779_s26  }
 0x16e PF: > { %p649_p0 = scmp.ge.s32.totalorder %s777_s20, 2  ;;  %s492_s11 = sand.u32 1, %s757_s15  }
 0x16f   : > { %s493_s12 = scalar_lea.sflag [#allocation4], %s492_s11 }
 0x170   : > { %p645_p1 = pnand %p649_p0, %p855_p8 }
 0x172   : > { %p646_p2 = pneg %p645_p1 }
 0x174   : > { %752 = dma.done.wait (%p646_p2), %s493_s12, 256  }
 0x175   : > { %754 = vsyncadd (%p646_p2), %s493_s12, 4294967040  ;;  %s17_s20 = sadd.s32 1, %s777_s20   ;;  %s956_s15 = smov %s761_s16 }
 0x176   : > { %p14_p3 = scmp.ge.s32.totalorder %s17_s20, 4   ;;  %s957_s16 = smov %s765_s17 }
 0x177   : > { %s958_s17 = smov %s861_s28  ;;  %s959_s18 = smov %s773_s19 }
 0x178   : > { %s960_s19 = smov %s962_s23  ;;  %16 = sbr.rel (!%p14_p3) target bundleno = 4 (0x4), region = 80 }
 0x17d   :  { %498 = vsyncpa [#allocation4], 1 }
 0x17e   :  { %500 = vsyncpa [#allocation4 + $0x1], 1 }

// kernel: tpu_custom_call.1
= control target key start
LH: loop header
LB: loop body
LE: loop exit
PB: predicated region body
PF: predicated region fallthrough
CT: control target
= control target key end

     0   :  { %9 = vsyncpa [#allocation4], 0  ;;  %s949_s0 = inlined_call_operand.vmem [shape: f32[2,24,8], index: 0, kind: input, shape index: {}]   ;;  %s950_s1 = inlined_call_operand.vmem [shape: f32[2,24,8], index: 1, kind: input, shape index: {}]   ;;  %s951_s2 = inlined_call_operand.vmem [shape: f32[24,16], index: 2, kind: input, shape index: {}]   ;;  %s952_s3 = inlined_call_operand.vmem [shape: f32[1,16], index: 3, kind: input, shape index: {}]   ;;  %s953_s4 = inlined_call_operand.hbm [shape: f32[2,16,16], index: 4, kind: output, shape index: {}]  }
   0x1   :  { %11 = vsyncpa [#allocation4 + $0x1], 0  ;;  %s808_s15 = smov 0   ;;  %s810_s16 = smov 0  }
   0x2   :  { %s812_s17 = smov 0   ;;  %s814_s18 = smov 0  }
   0x3   :  { %s816_s19 = smov 0   ;;  %s818_s20 = smov 0  }
   0x4 LB: > { %s605_s21 = sadd.s32 4294967295, %s777_s20   ;;  %s606_s22 = sadd.s32 4294967294, %s777_s20   ;;  %s777_s20 = sphi %s818_s20, %s17_s20   ;;  %s773_s19 = sphi %s816_s19, %s960_s19   ;;  %s769_s18 = sphi %s814_s18, %s959_s18   ;;  %s765_s17 = sphi %s812_s17, %s958_s17   ;;  %s761_s16 = sphi %s810_s16, %s957_s16   ;;  %s757_s15 = sphi %s808_s15, %s956_s15  }
   0x5   : > { %s36_s23 = sadd.s32 1, %s773_s19  ;;  %s159_s24 = sadd.s32 1, %s765_s17 }
   0x6   : > { %p38_p0 = scmp.ge.s32.totalorder %s36_s23, 2  ;;  %p169_p1 = scmp.ne.s32.totalorder %s765_s17, %s761_s16 }
   0x7   : > { %p170_p2 = scmp.eq.s32.totalorder %s605_s21, 1  ;;  %p175_p3 = scmp.ne.s32.totalorder %s761_s16, %s757_s15 }
   0x8   : > { %s962_s23 = smov (%p38_p0, %s36_s23), 0  ;;  %p176_p5 = scmp.eq.s32.totalorder %s606_s22, 1 }
   0x9   : > { %p848_p4 = por %p170_p2, %p169_p1  ;;  %s152_s26 = ssub.s32 %s773_s19, %s962_s23 }
   0xa   : > { %p611_p6 = scmp.ge.s32.totalorder %s777_s20, 1  ;;  %p157_p7 = scmp.eq.s32.totalorder %s152_s26, 0 }
   0xb   : > { %p855_p8 = por %p176_p5, %p175_p3  ;;  %p243_p9 = scmp.lt.s32.totalorder %s777_s20, 3 }
   0xc   : > { %s861_s28 = scalar_select %p157_p7, %s765_s17, %s159_s24  }
   0xd   : > { %p244_p10 = pnand %p611_p6, %p243_p9 }
   0xe   : > { %p299_p11 = scmp.lt.s32.totalorder (!%p244_p10), %s769_s18, 1  ;;  %s779_s26 = smov (!%p244_p10), 8  }
   0xf   : > { %247 = sbr.rel (%p244_p10) target bundleno = 366 (0x16e), region = 36  ;;  %s291_s30 = sand.u32 (!%p244_p10), 1, %s761_s16  }
  0x10   : > { %s612_s5 = sshll.u32 (!%p244_p10), %s291_s30, 4  ;;  %s625_s10 = sshll.u32 (!%p244_p10), %s769_s18, 8 }
  0x11   : > { %s900_s13 = scalar_lea.hbm (!%p244_p10), %s953_s4, %s625_s10  ;;  %s903_s14 = scalar_lea.sflag (!%p244_p10), [#allocation4], %s291_s30 }
  0x12   : > { %s781_s21 = smov (!%p244_p10), [#allocation3]  }
  0x13   : > { %s705_s22 = sshll.u32 (!%p244_p10), %s781_s21, 4  ;;  %s706_s22 = int_to_ptr.vmem [resolvable:$false] %s705_s22 }
  0x14   : > { %s300_s29 = scalar_select %p299_p11, %s769_s18, 1  ;;  %v368_v0 = vld [vmem:[%s951_s2 + $0x10] sm:$0xff]  ;;  %v367_v1 = vld [vmem:[%s951_s2 + $0x8] sm:$0xff]  ;;  %vm334_vm0 = vcmask 64512   ;;  %v366_v2 = vld [vmem:[%s951_s2] sm:$0xff]  ;;  %vm363_vm1 = vcmask 130048  }
  0x15   : > { %631 = vmatprep.subr.mxu0 %v368_v0  ;;  %vm376_vm2 = vcmask 195584   ;;  %v615_v20 = vld [vmem:[%s952_s3] ss:$0 sm:$0xff] }
  0x16   : > { %s640_s8 = smul.u32 24, %s300_s29  ;;  %632 = vmatpush3.msra.mxu0 %v368_v0  ;;  %s780_s29 = smov 16  }
  0x17   : > { %633 = vmatprep.subr.mxu0 %v367_v1 }
  0x18   : > { %s306_s11 = scalar_lea.vmem %s949_s0, %s640_s8  ;;  %s624_s12 = sadd.s32 16, %s640_s8  ;;  %634 = vmatpush3.msra.mxu0 %v367_v1 }
  0x19   : > { %v332_v3 = vld [vmem:[%s306_s11] sm:$0xff]  ;;  %v333_v4 = vld [vmem:[%s306_s11 + $0x8] sm:$0xff]  ;;  %s321_s24 = scalar_lea.vmem %s950_s1, %s624_s12  ;;  %635 = vmatprep.subr.mxu0 %v366_v2  ;;  %s293_s8 = scalar_lea.vmem [#allocation3], %s612_s5 }
  0x1a   : > { %335 = vst.msk [vmem:[#allocation2] sm:$0xff] %vm334_vm0, %v332_v3  ;;  %336 = vst.msk [vmem:[#allocation2 + $0x8] sm:$0xff] %vm334_vm0, %v333_v4  ;;  %v337_v5 = vld [vmem:[%s321_s24] sm:$0xff]  ;;  %636 = vmatpush3.msra.mxu0 %v366_v2  ;;  %s477_s9 = sshll.u32 %s293_s8, 4  ;;  %s707_s24 = scalar_lea.vmem %s706_s22, 512  ;;  %s894_s9 = int_to_ptr.vmem [resolvable:$true] %s477_s9 }
  0x1b   : > { %338 = vst.msk [vmem:[#allocation2 + $0x10] sm:$0xff] %vm334_vm0, %v337_v5  ;;  %s701_s18 = scalar_lea.vmem %s894_s9, 256  ;;  %p708_p1 = scmp.lt.s32.totalorder %s894_s9, %s706_s22 }
  0x1c   : > { %p702_p12 = scmp.ne.s32.totalorder %s894_s9, %s701_s18  ;;  %p709_p2 = scmp.lt.s32.totalorder %s707_s24, %s701_s18 }
  0x1e   : > { %p703_p13 = pnand %p702_p12, %p848_p4  ;;  %p710_p3 = por %p709_p2, %p708_p1 }
  0x20   : > { %p704_p0 = pneg %p703_p13 }
  0x21   : > { %v341_v6 = vld [vmem:[#allocation2 + $0x1] sm:$0xff] }
  0x22   : > { %v343_v7 = vld [vmem:[#allocation2 + $0x2] sm:$0xff]  ;;  %347 = vrot.lane.b32.xlu0 %v341_v6, %s779_s26  ;;  %v344_v9 = vld [vmem:[#allocation2 + $0xa] sm:$0xff]  ;;  %p711_p5 = pnand %p710_p3, %p704_p0 }
  0x23   : > { %355 = vrot.lane.b32.xlu1 %v343_v7, %s780_s29  ;;  %v342_v8 = vld [vmem:[#allocation2 + $0x9] sm:$0xff]  ;;  %v339_v10 = vld [vmem:[#allocation2] sm:$0xff] }
  0x24   : > { %v340_v15 = vld [vmem:[#allocation2 + $0x8] sm:$0xff] }
  0x26   : > { %349 = vrot.lane.b32.xlu0 %v342_v8, %s779_s26 }
  0x27   : > { %357 = vrot.lane.b32.xlu1 %v344_v9, %s780_s29 }
  0x94   : > { %v348_v11 = vpop.permute.xlu0 %347 }
  0x95   : > { %v356_v12 = vpop.permute.xlu1 %355  ;;  %v361_v13 = vsel %vm334_vm0, %v339_v10, %v348_v11 }
  0x96   : > { %v364_v14 = vsel %vm363_vm1, %v361_v13, %v356_v12 }
  0x97   : > { %637 = vmatprep.mubr.msk.f32.mxu0 %vm376_vm2, %v364_v14 }
  0x98   : > { %v350_v16 = vpop.permute.xlu0 %349 }
  0x99   : > { %v358_v17 = vpop.permute.xlu1 %357  ;;  %v362_v18 = vsel %vm334_vm0, %v340_v15, %v350_v16 }
  0x9a   : > { %v365_v19 = vsel %vm363_vm1, %v362_v18, %v358_v17 }
  0x9b   : > { %638 = vmatmul.mubr.msk.f32.vlgmr.msra.gmra.mxu0 %vm376_vm2, %v365_v19 }
 0x15b   : > { %v639_v21 = vpop.f32.mrf.mxu0 }
 0x15c   : > { %v455_v22 = vadd.f32 %v639_v21, %v615_v20 }
 0x15d   : > { %v449_v23 = vpop.f32.mrf.mxu0 }
 0x15e   : > { %459 = vst.msk [vmem:[%s293_s8 + $0x8] sm:$0xff] %vm363_vm1, %v455_v22  ;;  %v450_v24 = vadd.f32 %v615_v20, %v449_v23 }
 0x160   : > { %458 = vst.msk [vmem:[%s293_s8] sm:$0xff] %vm363_vm1, %v450_v24 }
 0x161   : > { %714 = shalt.err (!%p711_p5)
}
 0x162   : > { %s715_s29 = scalar_lea.hbm %s900_s13, 256  ;;  %s719_s6 = scalar_lea.hbm %s953_s4, 512 }
 0x163   : > { %p716_p6 = scmp.ne.s32.totalorder %s900_s13, %s715_s29  ;;  %p720_p10 = scmp.lt.s32.totalorder %s900_s13, %s953_s4 }
 0x164   : > { %p721_p11 = scmp.lt.s32.totalorder %s719_s6, %s715_s29 }
 0x165   : > { %p717_p7 = pnand %p716_p6, %p848_p4 }
 0x166   : > { %p722_p12 = por %p721_p11, %p720_p10 }
 0x167   : > { %p718_p9 = pneg %p717_p7 }
 0x169   : > { %p723_p13 = pnand %p722_p12, %p718_p9 }
 0x16b   : > { %726 = shalt.err (!%p723_p13)
}
 0x16c   : > { %s782_s10 = smov 128  }
 0x16d   : > { %642 = dma.vmem_to_hbm [thread:$0]  (%p848_p4), %s894_s9, 256, %s900_s13, %s903_s14, %s782_s10, %s782_s10, %s779_s26  }
 0x16e PF: > { %p649_p0 = scmp.ge.s32.totalorder %s777_s20, 2  ;;  %s492_s11 = sand.u32 1, %s757_s15  }
 0x16f   : > { %s493_s12 = scalar_lea.sflag [#allocation4], %s492_s11 }
 0x170   : > { %p645_p1 = pnand %p649_p0, %p855_p8 }
 0x172   : > { %p646_p2 = pneg %p645_p1 }
 0x174   : > { %752 = dma.done.wait (%p646_p2), %s493_s12, 256  }
 0x175   : > { %754 = vsyncadd (%p646_p2), %s493_s12, 4294967040  ;;  %s17_s20 = sadd.s32 1, %s777_s20   ;;  %s956_s15 = smov %s761_s16 }
 0x176   : > { %p14_p3 = scmp.ge.s32.totalorder %s17_s20, 4   ;;  %s957_s16 = smov %s765_s17 }
 0x177   : > { %s958_s17 = smov %s861_s28  ;;  %s959_s18 = smov %s773_s19 }
 0x178   : > { %s960_s19 = smov %s962_s23  ;;  %16 = sbr.rel (!%p14_p3) target bundleno = 4 (0x4), region = 80 }
 0x17d   :  { %498 = vsyncpa [#allocation4], 1 }
 0x17e   :  { %500 = vsyncpa [#allocation4 + $0x1], 1 }

</bundles_post_ra>
